<compile_context>
chip_gen: v6e
topology: v6e:2x2x1
jax: 0.10.0
libtpu: 0.0.40
codegen_flags: <defaults>
</compile_context>

<pallas_src>
import jax
import jax.numpy as jnp
from jax.experimental import pallas as pl
from jax.experimental.pallas import tpu as pltpu


def testnet_kernel(x_ref, wf_ref, o_ref):
    # x_ref : (bb, in)    f32   (cast to bf16 here; hidden under the tile DMA)
    # wf_ref: (in, out)   bf16  (fused, pre-transposed weight: (W2 @ W1).T)
    # o_ref : (bb, out)
    o_ref[...] = jnp.dot(
        x_ref[...].astype(jnp.bfloat16),
        wf_ref[...],
        preferred_element_type=jnp.float32,
    ).astype(o_ref.dtype)


def fold_weights(w1, w2):
    """One-time weight prep (do this at init, not per call).

    w1: (4*in, in), w2: (out, 4*in) in PyTorch nn.Linear layout.
    Returns Wf^T = (W2 @ W1).T with shape (in, out), bf16.
    Computed in f32, cast to bf16 exactly once (no double rounding).
    """
    wf = w2.astype(jnp.float32) @ w1.astype(jnp.float32)   # (out, in)
    return wf.T.astype(jnp.bfloat16)                       # (in, out)


def testnet_forward(x, wf_t, *, block_b=512, out_dtype=jnp.float32):
    """x: (B, in) f32; wf_t: (in, out) bf16 fused weight from fold_weights()."""
    B, in_size = x.shape
    in2, out_size = wf_t.shape
    assert in2 == in_size, (wf_t.shape, x.shape)

    # Single tile whenever possible (no pad, no tail slice, no extra grid steps on
    # single-TC v5e/v6e).  Tile the batch only when it divides block_b exactly.
    if B <= block_b or B % block_b != 0:
        bb = B
    else:
        assert block_b % 8 == 0, "block_b must be a multiple of 8 (sublane rule)"
        bb = block_b
    grid = (B // bb,)

    return pl.pallas_call(
        testnet_kernel,
        out_shape=jax.ShapeDtypeStruct((B, out_size), out_dtype),
        grid_spec=pl.GridSpec(
            grid=grid,
            in_specs=[
                pl.BlockSpec((bb, in_size), lambda i: (i, 0)),
                pl.BlockSpec((in_size, out_size), lambda i: (0, 0)),  # VMEM-resident
            ],
            out_specs=pl.BlockSpec((bb, out_size), lambda i: (i, 0)),
        ),
        compiler_params=pltpu.CompilerParams(
            # Batch tiles are independent -> megacore sharding on v7x when grid > 1.
            dimension_semantics=("parallel",)),
    )(x, wf_t)


if __name__ == "__main__":
    # Small shapes implied by the module: in_size=32 -> hidden=128, out_size=16, batch=8.
    in_size, out_size = 32, 16
    hidden = 4 * in_size
    B = 8

    key = jax.random.PRNGKey(0)
    kx, k1, k2 = jax.random.split(key, 3)

    x = jax.random.normal(kx, (B, in_size), dtype=jnp.float32)
    # PyTorch Linear weight shape = (out_features, in_features)
    w1 = jax.random.normal(k1, (hidden, in_size), dtype=jnp.float32) * 0.05
    w2 = jax.random.normal(k2, (out_size, hidden), dtype=jnp.float32) * 0.05

    wf_t = fold_weights(w1, w2)          # one-time at init
    out = jax.block_until_ready(testnet_forward(x, wf_t))

    # Cross-check against plain f32 JAX reference of the original two-linear forward.
    ref = (x @ w1.T) @ w2.T
    assert out.shape == (B, out_size)
    assert jnp.allclose(out, ref, atol=3e-2, rtol=3e-2), \
        float(jnp.max(jnp.abs(out - ref)))

    print("KERNEL_OK")
</pallas_src>

<mosaic_0001>
module attributes {stable_mosaic.version = 11 : i64} {
  func.func @testnet_kernel(%arg0: i32, %arg1: memref<8x32xf32, #tpu.memory_space<vmem>>, %arg2: memref<32x16xbf16, #tpu.memory_space<vmem>>, %arg3: memref<8x16xf32, #tpu.memory_space<vmem>>) attributes {dimension_semantics = [#tpu.dimension_semantics<parallel>], iteration_bounds = array<i64: 1>, scalar_prefetch = 0 : i64, scratch_operands = 0 : i64, tpu.core_type = #tpu.core_type<tc>, window_params = [{transform_indices = @transform_0, window_bounds = array<i64: 8, 32>}, {pipeline_mode = #tpu.pipeline_mode<synchronous>, transform_indices = @transform_1, window_bounds = array<i64: 32, 16>}, {transform_indices = @transform_2, window_bounds = array<i64: 8, 16>}]} {
    %c0 = arith.constant 0 : index
    %c0_0 = arith.constant 0 : index
    %0 = vector.load %arg1[%c0, %c0_0] : memref<8x32xf32, #tpu.memory_space<vmem>>, vector<8x32xf32>
    %1 = arith.truncf %0 : vector<8x32xf32> to vector<8x32xbf16>
    %c0_1 = arith.constant 0 : index
    %c0_2 = arith.constant 0 : index
    %2 = vector.load %arg2[%c0_1, %c0_2] : memref<32x16xbf16, #tpu.memory_space<vmem>>, vector<32x16xbf16>
    %cst = arith.constant dense<0.000000e+00> : vector<8x16xf32>
    %3 = tpu.matmul %1, %2, %cst {dimension_numbers = #tpu.dot_dimension_numbers<[1], [0], [0], [1], [0, 0, 1, 1], [], []>} : vector<8x32xbf16>, vector<32x16xbf16>, vector<8x16xf32> -> vector<8x16xf32>
    %c0_3 = arith.constant 0 : index
    %c0_4 = arith.constant 0 : index
    %4 = vector.load %arg3[%c0_3, %c0_4] : memref<8x16xf32, #tpu.memory_space<vmem>>, vector<8x16xf32>
    tpu.vector_store %arg3[%c0_3, %c0_4], %3 {strides = array<i32>} : memref<8x16xf32, #tpu.memory_space<vmem>>, vector<8x16xf32>,
    return
  }
  func.func @transform_0(%arg0: i32) -> (i32, i32) {
    %c0_i32 = arith.constant 0 : i32
    %c0_i32_0 = arith.constant 0 : i32
    return %arg0, %c0_i32 : i32, i32
  }
  func.func @transform_1(%arg0: i32) -> (i32, i32) {
    %c0_i32 = arith.constant 0 : i32
    %c0_i32_0 = arith.constant 0 : i32
    %c0_i32_1 = arith.constant 0 : i32
    return %c0_i32, %c0_i32_0 : i32, i32
  }
  func.func @transform_2(%arg0: i32) -> (i32, i32) {
    %c0_i32 = arith.constant 0 : i32
    %c0_i32_0 = arith.constant 0 : i32
    return %arg0, %c0_i32 : i32, i32
  }
}

</mosaic_0001>

<bundles_post_ra>
// kernel: tpu_custom_call.1
= control target key start
LH: loop header
LB: loop body
LE: loop exit
PB: predicated region body
PF: predicated region fallthrough
CT: control target
= control target key end

     0   :  { %v132_v1 = vmov 0.0   ;;  %vm133_vm0 = vmmov 0   ;;  %s162_s0 = inlined_call_operand.vmem [shape: f32[8,32], index: 0, kind: input, shape index: {}]   ;;  %s163_s1 = inlined_call_operand.vmem [shape: bf16[32,16], index: 1, kind: input, shape index: {}]   ;;  %s164_s2 = inlined_call_operand.hbm [shape: f32[8,16], index: 2, kind: output, shape index: {}]  }
   0x1   :  { %v108_v0 = vld [vmem:[%s163_s1 + $0x8] sm:$0xff]   ;;  %97 = vmatprep.subr.bf16.mxu0 %v132_v1  ;;  %v109_v2 = vld [vmem:[%s163_s1] sm:$0xff]   ;;  %101 = vmatprep.mubr.msk.bf16.mxu0 %vm133_vm0, %v132_v1 }
   0x2   :  { %98 = vmatpush3.bf16.msra.mxu0 %v108_v0  ;;  %v13_v3 = vld [vmem:[%s162_s0] sm:$0xff] }
   0x3   :  { %7 = vsyncpa [#allocation3], 0  ;;  %99 = vmatprep.subr.bf16.mxu0 %v132_v1  ;;  %v14_v4 = vpack.c.bf16 %v13_v3, %v13_v3  ;;  %vm31_vm1 = vcmask 261120   ;;  %s134_s15 = smov [#allocation2]   ;;  %vm75_vm2 = vcmask 130048  }
   0x4   :  { %s83_s16 = sshll.u32 %s134_s15, 4  ;;  %s84_s16 = int_to_ptr.vmem [resolvable:$true] %s83_s16 }
   0x5   :  { %s110_s1 = scalar_lea.vmem %s84_s16, 128  ;;  %p115_p1 = scmp.lt.s32.totalorder %s84_s16, %s84_s16 }
   0x6   :  { %100 = vmatpush3.bf16.msra.mxu0 %v109_v2  ;;  %p111_p0 = scmp.ne.s32.totalorder %s84_s16, %s110_s1  ;;  %p116_p2 = scmp.lt.s32.totalorder %s110_s1, %s110_s1 }
   0x8   :  { %p117_p3 = por %p116_p2, %p115_p1 }
   0x9   :  { %102 = vmatmul.mubr.msk.bf16.vlgmr.msra.gmra.mxu0 %vm31_vm1, %v14_v4 }
   0xa   :  { %p118_p4 = pnand %p117_p3, %p111_p0 }
  0xc9   :  { %v69_v5 = vpop.f32.mrf.mxu0 }
  0xca   :  { %76 = vst.msk [vmem:[#allocation2] sm:$0xff] %vm75_vm2, %v69_v5 }
  0xcb   :  { %v103_v6 = vpop.f32.mrf.mxu0 }
  0xcc   :  { %121 = shalt.err (!%p118_p4)
}
  0xcd   :  { %86 = dma.vmem_to_hbm [thread:$0]  %s84_s16, 128, %s164_s2, [#allocation3]   ;;  %v72_v7 = vpop.f32.mrf.mxu0 }
  0xcf   :  { %v104_v8 = vpop.f32.mrf.mxu0 }
  0xd0   :  { %130 = dma.done.wait [#allocation3], 128  }
  0xd1   :  { %131 = vsyncadd [#allocation3], 4294967168 }
  0xd2   :  { %90 = vsyncpa [#allocation3], 1 }

</bundles_post_ra>
